<compile_context>
chip_gen: v7x
topology: tpu7x:2x2x1
jax: 0.10.0
libtpu: 0.0.40
codegen_flags: <defaults>
</compile_context>

<pallas_src>
import functools

import jax
import jax.numpy as jnp
from jax import lax
from jax.experimental import pallas as pl
from jax.experimental.pallas import tpu as pltpu

# ~1 MiB (f32) per input block: 512 * 512 elements.
_TARGET_BLOCK_ELEMS = 512 * 512
_VMEM_LIMIT_BYTES = 32 * 1024 * 1024


# ---------------------------------------------------------------------------
# Kernel 1: Charbonnier partial-sum (used for 'mean' and 'sum')
# ---------------------------------------------------------------------------
def _charbonnier_sum_kernel(p_ref, t_ref, o_ref, acc_ref, *, eps, n_elems,
                            block_rows, cols, needs_mask):
    i = pl.program_id(0)

    @pl.when(i == 0)
    def _():
        acc_ref[...] = jnp.zeros_like(acc_ref)

    d = p_ref[...].astype(jnp.float32) - t_ref[...].astype(jnp.float32)
    v = jnp.sqrt(d * d + eps)

    if needs_mask:
        # Padding / partial-block garbage only ever lives in the last block.
        is_last = i == pl.num_programs(0) - 1

        @pl.when(is_last)
        def _():
            row = lax.broadcasted_iota(jnp.int32, (block_rows, cols), 0)
            col = lax.broadcasted_iota(jnp.int32, (block_rows, cols), 1)
            gidx = (i * block_rows + row) * cols + col   # int32: <2^31 elems
            acc_ref[...] += jnp.where(gidx < n_elems, v, 0.0)

        @pl.when(jnp.logical_not(is_last))
        def _():
            acc_ref[...] += v
    else:
        acc_ref[...] += v

    @pl.when(i == pl.num_programs(0) - 1)
    def _():
        # Single cross-lane/sublane reduction, done once.
        o_ref[...] = jnp.sum(acc_ref[...], keepdims=True)


# ---------------------------------------------------------------------------
# Kernel 2: elementwise Charbonnier (used for reduction='none')
# ---------------------------------------------------------------------------
def _charbonnier_elem_kernel(p_ref, t_ref, o_ref, *, eps):
    d = p_ref[...].astype(jnp.float32) - t_ref[...].astype(jnp.float32)
    o_ref[...] = jnp.sqrt(d * d + eps).astype(o_ref.dtype)


# ---------------------------------------------------------------------------
# Wrapper
# ---------------------------------------------------------------------------
def _choose_cols(n_elems):
    """Pick a lane-dense column width that divides n_elems if possible."""
    for cols in (512, 256, 128):
        if n_elems % cols == 0:
            return cols, False
    return 128, True   # ragged: needs a (small) zero pad of the flat tensor


def charbonnier_loss(pred, target, *, loss_weight=1.0, reduction='mean',
                     eps=1e-12):
    """JAX/Pallas equivalent of basicsr CharbonnierLoss.forward (weight=None)."""
    if reduction not in ('none', 'mean', 'sum'):
        raise ValueError(f'Unsupported reduction mode: {reduction}.')
    if pred.shape != target.shape:
        raise ValueError('pred and target must have the same shape.')

    orig_shape = pred.shape
    n_elems = pred.size

    cols, ragged = _choose_cols(n_elems)
    rows = pl.cdiv(n_elems, cols)

    # Flatten (no dtype cast, no pad in the common case).
    p_flat = pred.reshape(-1)
    t_flat = target.reshape(-1)
    if ragged:
        pad = rows * cols - n_elems
        p_flat = jnp.pad(p_flat, (0, pad))
        t_flat = jnp.pad(t_flat, (0, pad))
    p2 = p_flat.reshape(rows, cols)
    t2 = t_flat.reshape(rows, cols)

    # Block sizing: ~1 MiB (f32) per input block, rows a multiple of 8 unless
    # the block spans the whole slab.
    max_block_rows = max(8, (_TARGET_BLOCK_ELEMS // cols) // 8 * 8)
    block_rows = rows if rows <= max_block_rows else max_block_rows
    num_blocks = pl.cdiv(rows, block_rows)
    grid = (num_blocks,)
    tile_spec = pl.BlockSpec((block_rows, cols), lambda i: (i, 0))

    if reduction == 'none':
        out2 = pl.pallas_call(
            functools.partial(_charbonnier_elem_kernel, eps=eps),
            out_shape=jax.ShapeDtypeStruct((rows, cols), pred.dtype),
            grid_spec=pltpu.PrefetchScalarGridSpec(
                num_scalar_prefetch=0,
                grid=grid,
                in_specs=[tile_spec, tile_spec],
                out_specs=tile_spec,
            ),
            compiler_params=pltpu.CompilerParams(
                dimension_semantics=("parallel",),
                vmem_limit_bytes=_VMEM_LIMIT_BYTES),
        )(p2, t2)
        if ragged:
            out = out2.reshape(-1)[:n_elems].reshape(orig_shape)
        else:
            out = out2.reshape(orig_shape)
        return loss_weight * out

    # 'mean' / 'sum': masked partial-sum with a tile-shaped f32 accumulator.
    needs_mask = (num_blocks * block_rows * cols) != n_elems
    total = pl.pallas_call(
        functools.partial(_charbonnier_sum_kernel, eps=eps, n_elems=n_elems,
                          block_rows=block_rows, cols=cols,
                          needs_mask=needs_mask),
        out_shape=jax.ShapeDtypeStruct((1, 1), jnp.float32),
        grid_spec=pltpu.PrefetchScalarGridSpec(
            num_scalar_prefetch=0,
            grid=grid,
            in_specs=[tile_spec, tile_spec],
            out_specs=pl.BlockSpec((1, 1), lambda i: (0, 0)),
            scratch_shapes=[pltpu.VMEM((block_rows, cols), jnp.float32)],
        ),
        compiler_params=pltpu.CompilerParams(
            dimension_semantics=("arbitrary",),
            vmem_limit_bytes=_VMEM_LIMIT_BYTES),
    )(p2, t2)

    total = total[0, 0]
    if reduction == 'mean':
        total = total / jnp.float32(n_elems)
    return loss_weight * total


# TODO(synk): the optional per-element `weight` argument of the PyTorch forward
# (basicsr's weighted_loss normalization) is not wired up; the default call
# path (weight=None) is implemented exactly.


if __name__ == "__main__":
    key = jax.random.PRNGKey(0)
    k1, k2, k3, k4 = jax.random.split(key, 4)
    N, C, H, W = 2, 4, 16, 16
    pred = jax.random.normal(k1, (N, C, H, W), dtype=jnp.float32)
    target = jax.random.normal(k2, (N, C, H, W), dtype=jnp.float32)
    eps = 1e-12

    # default path: reduction='mean'
    loss = charbonnier_loss(pred, target, loss_weight=1.0,
                            reduction='mean', eps=eps)
    loss = jax.block_until_ready(loss)
    ref = jnp.mean(jnp.sqrt((pred - target) ** 2 + eps))
    assert jnp.allclose(loss, ref, rtol=1e-5, atol=1e-6), (loss, ref)

    # reduction='none'
    loss_none = charbonnier_loss(pred, target, reduction='none', eps=eps)
    loss_none = jax.block_until_ready(loss_none)
    ref_none = jnp.sqrt((pred - target) ** 2 + eps)
    assert loss_none.shape == pred.shape
    assert jnp.allclose(loss_none, ref_none, rtol=1e-5, atol=1e-6)

    # reduction='sum' on a ragged shape (exercises the in-kernel tail mask)
    p2 = jax.random.normal(k3, (3, 3, 7, 5), dtype=jnp.float32)
    t2 = jax.random.normal(k4, (3, 3, 7, 5), dtype=jnp.float32)
    loss_sum = charbonnier_loss(p2, t2, reduction='sum', eps=eps)
    loss_sum = jax.block_until_ready(loss_sum)
    ref_sum = jnp.sum(jnp.sqrt((p2 - t2) ** 2 + eps))
    assert jnp.allclose(loss_sum, ref_sum, rtol=1e-5, atol=1e-4), (loss_sum, ref_sum)

    print("KERNEL_OK")
</pallas_src>

<mosaic_0001>
module attributes {stable_mosaic.version = 11 : i64} {
  func.func @_charbonnier_sum_kernel(%arg0: i32, %arg1: memref<4x512xf32, #tpu.memory_space<vmem>>, %arg2: memref<4x512xf32, #tpu.memory_space<vmem>>, %arg3: memref<1x1xf32, #tpu.memory_space<vmem>>, %arg4: memref<4x512xf32, #tpu.memory_space<vmem>>) attributes {dimension_semantics = [#tpu.dimension_semantics<arbitrary>], iteration_bounds = array<i64: 1>, scalar_prefetch = 0 : i64, scratch_operands = 1 : i64, tpu.core_type = #tpu.core_type<tc>, window_params = [{transform_indices = @transform_0, window_bounds = array<i64: 4, 512>}, {transform_indices = @transform_1, window_bounds = array<i64: 4, 512>}, {pipeline_mode = #tpu.pipeline_mode<synchronous>, transform_indices = @transform_2, window_bounds = array<i64: 1, 1>}]} {
    %c0_i32 = arith.constant 0 : i32
    %0 = arith.cmpi eq, %arg0, %c0_i32 : i32
    %1 = arith.extui %0 : i1 to i32
    %c0_i32_0 = arith.constant 0 : i32
    %2 = arith.cmpi ne, %1, %c0_i32_0 : i32
    scf.if %2 {
      %cst_10 = arith.constant 0.000000e+00 : f32
      %16 = vector.broadcast %cst_10 : f32 to vector<4x512xf32>
      %c0_11 = arith.constant 0 : index
      %c0_12 = arith.constant 0 : index
      %17 = vector.load %arg4[%c0_11, %c0_12] : memref<4x512xf32, #tpu.memory_space<vmem>>, vector<4x512xf32>
      tpu.vector_store %arg4[%c0_11, %c0_12], %16 {strides = array<i32>} : memref<4x512xf32, #tpu.memory_space<vmem>>, vector<4x512xf32>,
    } else {
    }
    %c0 = arith.constant 0 : index
    %c0_1 = arith.constant 0 : index
    %3 = vector.load %arg1[%c0, %c0_1] : memref<4x512xf32, #tpu.memory_space<vmem>>, vector<4x512xf32>
    %c0_2 = arith.constant 0 : index
    %c0_3 = arith.constant 0 : index
    %4 = vector.load %arg2[%c0_2, %c0_3] : memref<4x512xf32, #tpu.memory_space<vmem>>, vector<4x512xf32>
    %5 = arith.subf %3, %4 : vector<4x512xf32>
    %6 = arith.mulf %5, %5 : vector<4x512xf32>
    %cst = arith.constant 9.99999996E-13 : f32
    %7 = vector.broadcast %cst : f32 to vector<4x512xf32>
    %8 = arith.addf %6, %7 : vector<4x512xf32>
    %9 = math.sqrt %8 : vector<4x512xf32>
    %c0_4 = arith.constant 0 : index
    %c0_5 = arith.constant 0 : index
    %10 = vector.load %arg4[%c0_4, %c0_5] : memref<4x512xf32, #tpu.memory_space<vmem>>, vector<4x512xf32>
    %11 = arith.addf %10, %9 : vector<4x512xf32>
    %c0_6 = arith.constant 0 : index
    %c0_7 = arith.constant 0 : index
    %12 = vector.load %arg4[%c0_6, %c0_7] : memref<4x512xf32, #tpu.memory_space<vmem>>, vector<4x512xf32>
    tpu.vector_store %arg4[%c0_6, %c0_7], %11 {strides = array<i32>} : memref<4x512xf32, #tpu.memory_space<vmem>>, vector<4x512xf32>,
    %c0_i32_8 = arith.constant 0 : i32
    %13 = arith.cmpi eq, %arg0, %c0_i32_8 : i32
    %14 = arith.extui %13 : i1 to i32
    %c0_i32_9 = arith.constant 0 : i32
    %15 = arith.cmpi ne, %14, %c0_i32_9 : i32
    scf.if %15 {
      %c0_10 = arith.constant 0 : index
      %c0_11 = arith.constant 0 : index
      %16 = vector.load %arg4[%c0_10, %c0_11] : memref<4x512xf32, #tpu.memory_space<vmem>>, vector<4x512xf32>
      %17 = vector.shape_cast %16 : vector<4x512xf32> to vector<1x4x512xf32>
      %cst_12 = arith.constant dense<0.000000e+00> : vector<1xf32>
      %18 = vector.multi_reduction <add>, %17, %cst_12 [1, 2] : vector<1x4x512xf32> to vector<1xf32>
      %19 = vector.shape_cast %18 : vector<1xf32> to vector<1x1x1xf32>
      %20 = vector.extract %19[0, 0, 0] : f32 from vector<1x1x1xf32>
      %21 = vector.broadcast %20 : f32 to vector<1x1xf32>
      %c0_13 = arith.constant 0 : index
      %c0_14 = arith.constant 0 : index
      %22 = vector.load %arg3[%c0_13, %c0_14] : memref<1x1xf32, #tpu.memory_space<vmem>>, vector<1x1xf32>
      tpu.vector_store %arg3[%c0_13, %c0_14], %21 {strides = array<i32>} : memref<1x1xf32, #tpu.memory_space<vmem>>, vector<1x1xf32>,
    } else {
    }
    return
  }
  func.func @transform_0(%arg0: i32) -> (i32, i32) {
    %c0_i32 = arith.constant 0 : i32
    %c0_i32_0 = arith.constant 0 : i32
    return %arg0, %c0_i32 : i32, i32
  }
  func.func @transform_1(%arg0: i32) -> (i32, i32) {
    %c0_i32 = arith.constant 0 : i32
    %c0_i32_0 = arith.constant 0 : i32
    return %arg0, %c0_i32 : i32, i32
  }
  func.func @transform_2(%arg0: i32) -> (i32, i32) {
    %c0_i32 = arith.constant 0 : i32
    %c0_i32_0 = arith.constant 0 : i32
    %c0_i32_1 = arith.constant 0 : i32
    return %c0_i32, %c0_i32_0 : i32, i32
  }
}

</mosaic_0001>

<bundles_post_ra>
// kernel: tpu_custom_call.1
= control target key start
LH: loop header
LB: loop body
LE: loop exit
PB: predicated region body
PF: predicated region fallthrough
CT: control target
= control target key end

     0   :  { %7 = vsyncpa [#allocation4], 0  ;;  %s254_s0 = inlined_call_operand.hbm [shape: f32[4,512], index: 0, kind: input, shape index: {}]   ;;  %s255_s1 = inlined_call_operand.hbm [shape: f32[4,512], index: 1, kind: input, shape index: {}]   ;;  %s256_s2 = inlined_call_operand.hbm [shape: f32[1,1], index: 2, kind: output, shape index: {}]  }
   0x1   :  { %8 = vsyncpa [#allocation7], 0 }
   0x2   :  { %9 = vsyncpa [#allocation5], 0  ;;  %s200_s9 = smov [#allocation3]   ;;  %s201_s11 = smov [#allocation6]  }
   0x3   :  { %s16_s10 = sshll.u32 %s200_s9, 4  ;;  %s26_s12 = sshll.u32 %s201_s11, 4  ;;  %s17_s10 = int_to_ptr.vmem [resolvable:$true] %s16_s10  ;;  %s27_s12 = int_to_ptr.vmem [resolvable:$true] %s26_s12 }
   0x4   :  { %s128_s15 = scalar_lea.hbm %s254_s0, 256 }
   0x5   :  { %p129_p0 = scmp.ne.s32.totalorder %s254_s0, %s128_s15  ;;  %p132_p1 = scmp.lt.u32.totalorder %s128_s15, %s254_s0 }
   0x7   :  { %p134_p2 = pnand %p132_p1, %p129_p0 }
   0x9   :  { %137 = shalt.err (!%p134_p2)
}
   0xa   :  { %s138_s20 = scalar_lea.vmem %s17_s10, 256  ;;  %p143_p4 = scmp.lt.s32.totalorder %s17_s10, %s17_s10 }
   0xb   :  { %p139_p3 = scmp.ne.s32.totalorder %s17_s10, %s138_s20  ;;  %p144_p5 = scmp.lt.s32.totalorder %s138_s20, %s138_s20 }
   0xd   :  { %p145_p6 = por %p144_p5, %p143_p4 }
   0xf   :  { %p146_p7 = pnand %p145_p6, %p139_p3 }
  0x11   :  { %149 = shalt.err (!%p146_p7)
}
  0x12   :  { %19 = dma.hbm_to_vmem [thread:$0]  %s254_s0, 256, %s17_s10, [#allocation4]  }
  0x13   :  { %s150_s25 = scalar_lea.hbm %s255_s1, 256 }
  0x14   :  { %p151_p8 = scmp.ne.s32.totalorder %s255_s1, %s150_s25  ;;  %p154_p9 = scmp.lt.u32.totalorder %s150_s25, %s255_s1 }
  0x16   :  { %p156_p10 = pnand %p154_p9, %p151_p8 }
  0x18   :  { %159 = shalt.err (!%p156_p10)
}
  0x19   :  { %s160_s30 = scalar_lea.vmem %s27_s12, 256  ;;  %p165_p12 = scmp.lt.s32.totalorder %s27_s12, %s27_s12 }
  0x1a   :  { %p161_p11 = scmp.ne.s32.totalorder %s27_s12, %s160_s30  ;;  %p166_p13 = scmp.lt.s32.totalorder %s160_s30, %s160_s30 }
  0x1c   :  { %p167_p0 = por %p166_p13, %p165_p12 }
  0x1e   :  { %p168_p1 = pnand %p167_p0, %p161_p11 }
  0x20   :  { %171 = shalt.err (!%p168_p1)
}
  0x21   :  { %29 = dma.hbm_to_vmem [thread:$0]  %s255_s1, 256, %s27_s12, [#allocation7]  }
  0x22   :  { %194 = dma.done.wait [#allocation4], 256  }
  0x23   :  { %195 = vsyncadd [#allocation4], 4294967040 }
  0x24   :  { %196 = dma.done.wait [#allocation7], 256  }
  0x25   :  { %197 = vsyncadd [#allocation7], 4294967040  ;;  %v42_v0 = vld [vmem:[#allocation3] sm:$0xff]  ;;  %v43_v1 = vld [vmem:[#allocation3 + $0x8] sm:$0xff]  ;;  %vm83_vm4 = vcmask 1043456   ;;  %s202_s1 = smov [#allocation8]  }
  0x26   :  { %v44_v2 = vld [vmem:[#allocation6] sm:$0xff]  ;;  %v45_v3 = vld [vmem:[#allocation6 + $0x8] sm:$0xff]  ;;  %s109_s4 = sshll.u32 %s202_s1, 4  ;;  %vm101_vm5 = vcmask 0   ;;  %s110_s4 = int_to_ptr.vmem [resolvable:$true] %s109_s4 }
  0x27   :  { %v46_v4 = vsub.f32 %v42_v0, %v44_v2  ;;  %v47_v5 = vsub.f32 %v43_v1, %v45_v3  ;;  %s172_s6 = scalar_lea.vmem %s110_s4, 16  ;;  %s176_s7 = scalar_lea.vmem %s110_s4, 32 }
  0x28   :  { %p173_p2 = scmp.ne.s32.totalorder %s110_s4, %s172_s6  ;;  %p177_p3 = scmp.lt.s32.totalorder %s110_s4, %s110_s4 }
  0x29   :  { %v48_v6 = vmul.f32 %v46_v4, %v46_v4  ;;  %v49_v7 = vmul.f32 %v47_v5, %v47_v5  ;;  %p178_p4 = scmp.lt.s32.totalorder %s176_s7, %s172_s6 }
  0x2b   :  { %v50_v8 = vadd.f32 1e-12, %v48_v6  ;;  %v51_v9 = vadd.f32 1e-12, %v49_v7  ;;  %p179_p5 = por %p178_p4, %p177_p3 }
  0x2d   :  { %124 = vrsqrt.f32 %v50_v8  ;;  %vm54_vm0 = vcmp.eq.f32.partialorder %v50_v8, inf  ;;  %v57_v11 = vand.u32 2147483648, %v50_v8  ;;  %vm56_vm1 = vcmp.eq.f32.partialorder %v50_v8, 0.0  ;;  %p180_p6 = pnand %p179_p5, %p173_p2 }
  0x2e   :  { %126 = vrsqrt.f32 %v51_v9  ;;  %vm61_vm2 = vcmp.eq.f32.partialorder %v51_v9, inf  ;;  %v64_v14 = vand.u32 2147483648, %v51_v9  ;;  %vm63_vm3 = vcmp.eq.f32.partialorder %v51_v9, 0.0 }
  0x37   :  { %v125_v10 = vpop.eup %124 }
  0x38   :  { %v127_v12 = vpop.eup %126  ;;  %v53_v13 = vmul.f32 %v125_v10, %v50_v8 }
  0x39   :  { %v60_v15 = vmul.f32 %v127_v12, %v51_v9 }
  0x3a   :  { %v55_v16 = vsel %vm54_vm0, %v50_v8, %v53_v13 }
  0x3b   :  { %v58_v17 = vsel %vm56_vm1, %v57_v11, %v55_v16  ;;  %v62_v18 = vsel %vm61_vm2, %v51_v9, %v60_v15 }
  0x3c   :  { %v65_v19 = vsel %vm63_vm3, %v64_v14, %v62_v18  ;;  %v79_v20 = vcombine.high %v58_v17, %v58_v17  ;;  %v84_v21 = vsel %vm83_vm4, %v58_v17, 0.0 }
  0x3d   :  { %v80_v22 = vcombine.high %v65_v19, %v65_v19  ;;  %v87_v24 = vsel %vm83_vm4, %v65_v19, 0.0 }
  0x3e   :  { %v85_v23 = vsel %vm83_vm4, %v79_v20, 0.0 }
  0x3f   :  { %v86_v25 = vadd.f32 %v85_v23, %v84_v21  ;;  %v89_v26 = vsel %vm83_vm4, %v80_v22, 0.0 }
  0x41   :  { %v88_v27 = vadd.f32 %v87_v24, %v86_v25 }
  0x43   :  { %v90_v28 = vadd.f32 %v89_v26, %v88_v27 }
  0x45   :  { %91 = vadd.xlane.f32.xlu0 %v90_v28 }
  0xd2   :  { %v92_v29 = vpop.xlane.xlu0 %91 }
  0xd3   :  { %v93_v30 = vrot.slane %v92_v29, 4 }
  0xd5   :  { %v94_v31 = vadd.f32 %v93_v30, %v92_v29 }
  0xd7   :  { %v95_v32 = vrot.slane %v94_v31, 2 }
  0xd9   :  { %v96_v33 = vadd.f32 %v95_v32, %v94_v31 }
  0xdb   :  { %v97_v34 = vrot.slane %v96_v33, 1 }
  0xdd   :  { %v98_v35 = vadd.f32 %v97_v34, %v96_v33 }
  0xdf   :  { %119 = vpush %v98_v35 }
 0x110   :  { %s120_s5 = spop %119 }
 0x111   :  { %v100_v36 = vstv %s120_s5 }
 0x112   :  { %102 = vst.msk [vmem:[#allocation8] sm:$0x1] %vm101_vm5, %v100_v36 }
 0x113   :  { %183 = shalt.err (!%p180_p6)
}
 0x114   :  { %s184_s10 = scalar_lea.hbm %s256_s2, 16 }
 0x115   :  { %p185_p7 = scmp.ne.s32.totalorder %s256_s2, %s184_s10  ;;  %p188_p8 = scmp.lt.u32.totalorder %s184_s10, %s256_s2 }
 0x117   :  { %p190_p9 = pnand %p188_p8, %p185_p7 }
 0x119   :  { %193 = shalt.err (!%p190_p9)
}
 0x11a   :  { %112 = dma.vmem_to_hbm [thread:$0]  %s110_s4, 16, %s256_s2, [#allocation5]  }
 0x11b   :  { %198 = dma.done.wait [#allocation5], 16  }
 0x11c   :  { %199 = vsyncadd [#allocation5], 4294967280 }
 0x11d   :  { %116 = vsyncpa [#allocation4], 1 }
 0x11e   :  { %117 = vsyncpa [#allocation7], 1 }
 0x11f   :  { %118 = vsyncpa [#allocation5], 1 }

</bundles_post_ra>
